<compile_context>
chip_gen: v7x
topology: tpu7x:2x2x1
jax: 0.10.0
libtpu: 0.0.40
codegen_flags: <defaults>
</compile_context>

<pallas_src>
import functools

import jax
import jax.numpy as jnp
from jax.experimental import pallas as pl
from jax.experimental.pallas import tpu as pltpu

LANE = 128  # TPU lane width


def _round_up(n, m):
    return ((n + m - 1) // m) * m


def _mlp_kernel(x_ref, w1_ref, b1_ref, w2_ref, b2_ref,
                w3_ref, b3_ref, w4_ref, b4_ref, o_ref):
    # Layer 1: [bt, 10] @ [10, 128]  (bf16 MXU, f32 accumulate)
    h = jnp.dot(x_ref[...], w1_ref[...], preferred_element_type=jnp.float32)
    h = jnp.maximum(h + b1_ref[...], 0.0).astype(jnp.bfloat16)

    # Layer 2: [bt, 128] @ [128, 128]  (cols >= 64 are zero-padded)
    h = jnp.dot(h, w2_ref[...], preferred_element_type=jnp.float32)
    h = jnp.maximum(h + b2_ref[...], 0.0).astype(jnp.bfloat16)

    # Layer 3: [bt, 128] @ [128, 128]  (rows >= 64 / cols >= 32 zero-padded)
    h = jnp.dot(h, w3_ref[...], preferred_element_type=jnp.float32)
    h = jnp.maximum(h + b3_ref[...], 0.0).astype(jnp.bfloat16)

    # Layer 4 (no ReLU): lane-dense 128-wide padded output, unmasked f32 store.
    o_ref[...] = jnp.dot(h, w4_ref[...],
                         preferred_element_type=jnp.float32) + b4_ref[...]


@functools.partial(jax.jit, static_argnames=("batch_tile",))
def fc1_forward(x, params, *, batch_tile=None):
    """Run the fc1 classifier on x of shape [B, 10]. Returns [B, num_classes] f32."""
    (w1, b1), (w2, b2), (w3, b3), (w4, b4) = params
    B, D_in = x.shape
    num_classes = w4.shape[-1]

    if batch_tile is None:
        # Fixed tile so the grid has many steps at large B; 16-row alignment
        # matches bf16 sublane packing. Per-step footprint stays far under VMEM.
        batch_tile = 512 if B >= 512 else _round_up(B, 16)
    assert batch_tile % 16 == 0, "batch_tile must be a multiple of 16 (bf16 sublanes)"

    B_pad = _round_up(B, batch_tile)

    # Zero-pad feature dims to 128 lanes, cast weights to bf16 (biases stay f32).
    def prep(w, b, k_pad, n_pad):
        w = jnp.asarray(w, jnp.float32)
        b = jnp.asarray(b, jnp.float32).reshape(1, -1)
        w_p = jnp.pad(w.astype(jnp.bfloat16),
                      ((0, k_pad - w.shape[0]), (0, n_pad - w.shape[1])))
        b_p = jnp.pad(b, ((0, 0), (0, n_pad - b.shape[1])))
        return w_p, b_p

    w1p, b1p = prep(w1, b1, D_in, LANE)
    w2p, b2p = prep(w2, b2, LANE, LANE)
    w3p, b3p = prep(w3, b3, LANE, LANE)
    w4p, b4p = prep(w4, b4, LANE, LANE)

    x_p = x.astype(jnp.bfloat16)
    if B_pad != B:
        x_p = jnp.pad(x_p, ((0, B_pad - B), (0, 0)))

    def const_spec(shape):
        return pl.BlockSpec(shape, lambda i: (0, 0))

    grid = (B_pad // batch_tile,)
    out = pl.pallas_call(
        _mlp_kernel,
        out_shape=jax.ShapeDtypeStruct((B_pad, LANE), jnp.float32),
        grid_spec=pltpu.PrefetchScalarGridSpec(
            num_scalar_prefetch=0,
            grid=grid,
            in_specs=[
                pl.BlockSpec((batch_tile, D_in), lambda i: (i, 0)),  # x tile
                const_spec(w1p.shape), const_spec(b1p.shape),
                const_spec(w2p.shape), const_spec(b2p.shape),
                const_spec(w3p.shape), const_spec(b3p.shape),
                const_spec(w4p.shape), const_spec(b4p.shape),
            ],
            out_specs=pl.BlockSpec((batch_tile, LANE), lambda i: (i, 0)),
        ),
        compiler_params=pltpu.CompilerParams(
            dimension_semantics=("parallel",),   # batch axis shards across TCs
            vmem_limit_bytes=64 << 20,
        ),
    )(x_p, w1p, b1p, w2p, b2p, w3p, b3p, w4p, b4p)

    return out[:B, :num_classes]


def init_params(key, num_classes=3):
    """Deterministic init mimicking PyTorch nn.Linear default (U[-1/sqrt(fan_in), ...])."""
    dims = [(10, 128), (128, 64), (64, 32), (32, num_classes)]
    params = []
    for (fan_in, fan_out) in dims:
        key, kw, kb = jax.random.split(key, 3)
        bound = 1.0 / jnp.sqrt(jnp.float32(fan_in))
        w = jax.random.uniform(kw, (fan_in, fan_out), jnp.float32, -bound, bound)
        b = jax.random.uniform(kb, (fan_out,), jnp.float32, -bound, bound)
        params.append((w, b))
    return params


def _reference(x, params):
    """Pure-JAX reference mirroring the kernel's bf16-input / f32-accumulate pipeline."""
    h = x.astype(jnp.bfloat16)
    n = len(params)
    for i, (w, b) in enumerate(params):
        h = jnp.dot(h, w.astype(jnp.bfloat16),
                    preferred_element_type=jnp.float32) + b.reshape(1, -1)
        if i < n - 1:
            h = jnp.maximum(h, 0.0).astype(jnp.bfloat16)
    return h


if __name__ == "__main__":
    key = jax.random.PRNGKey(0)
    k_params, k_x1, k_x2 = jax.random.split(key, 3)

    num_classes = 3
    params = init_params(k_params, num_classes=num_classes)

    # Small batch (single grid step).
    B1 = 8
    x1 = jax.random.normal(k_x1, (B1, 10), jnp.float32)
    out1 = jax.block_until_ready(fc1_forward(x1, params))
    ref1 = _reference(x1, params)
    assert out1.shape == (B1, num_classes)
    assert jnp.allclose(out1, ref1, atol=1e-2, rtol=1e-2)

    # Larger batch with an explicit small tile to exercise the multi-step
    # pipelined grid path (3 grid steps, padded batch).
    B2 = 40
    x2 = jax.random.normal(k_x2, (B2, 10), jnp.float32)
    out2 = jax.block_until_ready(fc1_forward(x2, params, batch_tile=16))
    ref2 = _reference(x2, params)
    assert out2.shape == (B2, num_classes)
    assert jnp.allclose(out2, ref2, atol=1e-2, rtol=1e-2)

    print("KERNEL_OK")
</pallas_src>

<mosaic_0001>
module attributes {stable_mosaic.version = 11 : i64} {
  func.func @_mlp_kernel(%arg0: i32, %arg1: memref<16x10xbf16, #tpu.memory_space<vmem>>, %arg2: memref<10x128xbf16, #tpu.memory_space<vmem>>, %arg3: memref<1x128xf32, #tpu.memory_space<vmem>>, %arg4: memref<128x128xbf16, #tpu.memory_space<vmem>>, %arg5: memref<1x128xf32, #tpu.memory_space<vmem>>, %arg6: memref<128x128xbf16, #tpu.memory_space<vmem>>, %arg7: memref<1x128xf32, #tpu.memory_space<vmem>>, %arg8: memref<128x128xbf16, #tpu.memory_space<vmem>>, %arg9: memref<1x128xf32, #tpu.memory_space<vmem>>, %arg10: memref<16x128xf32, #tpu.memory_space<vmem>>) attributes {dimension_semantics = [#tpu.dimension_semantics<parallel>], iteration_bounds = array<i64: 1>, scalar_prefetch = 0 : i64, scratch_operands = 0 : i64, tpu.core_type = #tpu.core_type<tc>, window_params = [{transform_indices = @transform_0, window_bounds = array<i64: 16, 10>}, {pipeline_mode = #tpu.pipeline_mode<synchronous>, transform_indices = @transform_1, window_bounds = array<i64: 10, 128>}, {pipeline_mode = #tpu.pipeline_mode<synchronous>, transform_indices = @transform_2, window_bounds = array<i64: 1, 128>}, {pipeline_mode = #tpu.pipeline_mode<synchronous>, transform_indices = @transform_3, window_bounds = array<i64: 128, 128>}, {pipeline_mode = #tpu.pipeline_mode<synchronous>, transform_indices = @transform_4, window_bounds = array<i64: 1, 128>}, {pipeline_mode = #tpu.pipeline_mode<synchronous>, transform_indices = @transform_5, window_bounds = array<i64: 128, 128>}, {pipeline_mode = #tpu.pipeline_mode<synchronous>, transform_indices = @transform_6, window_bounds = array<i64: 1, 128>}, {pipeline_mode = #tpu.pipeline_mode<synchronous>, transform_indices = @transform_7, window_bounds = array<i64: 128, 128>}, {pipeline_mode = #tpu.pipeline_mode<synchronous>, transform_indices = @transform_8, window_bounds = array<i64: 1, 128>}, {transform_indices = @transform_9, window_bounds = array<i64: 16, 128>}]} {
    %c0 = arith.constant 0 : index
    %c0_0 = arith.constant 0 : index
    %0 = vector.load %arg1[%c0, %c0_0] : memref<16x10xbf16, #tpu.memory_space<vmem>>, vector<16x10xbf16>
    %c0_1 = arith.constant 0 : index
    %c0_2 = arith.constant 0 : index
    %1 = vector.load %arg2[%c0_1, %c0_2] : memref<10x128xbf16, #tpu.memory_space<vmem>>, vector<10x128xbf16>
    %cst = arith.constant dense<0.000000e+00> : vector<16x128xf32>
    %2 = tpu.matmul %0, %1, %cst {dimension_numbers = #tpu.dot_dimension_numbers<[1], [0], [0], [1], [0, 0, 1, 1], [], []>} : vector<16x10xbf16>, vector<10x128xbf16>, vector<16x128xf32> -> vector<16x128xf32>
    %c0_3 = arith.constant 0 : index
    %c0_4 = arith.constant 0 : index
    %3 = vector.load %arg3[%c0_3, %c0_4] : memref<1x128xf32, #tpu.memory_space<vmem>>, vector<1x128xf32>
    %4 = vector.broadcast %3 : vector<1x128xf32> to vector<16x128xf32>
    %5 = arith.addf %2, %4 : vector<16x128xf32>
    %cst_5 = arith.constant 0.000000e+00 : f32
    %6 = vector.broadcast %cst_5 : f32 to vector<16x128xf32>
    %7 = arith.maximumf %5, %6 : vector<16x128xf32>
    %8 = arith.truncf %7 : vector<16x128xf32> to vector<16x128xbf16>
    %c0_6 = arith.constant 0 : index
    %c0_7 = arith.constant 0 : index
    %9 = vector.load %arg4[%c0_6, %c0_7] : memref<128x128xbf16, #tpu.memory_space<vmem>>, vector<128x128xbf16>
    %cst_8 = arith.constant dense<0.000000e+00> : vector<16x128xf32>
    %10 = tpu.matmul %8, %9, %cst_8 {dimension_numbers = #tpu.dot_dimension_numbers<[1], [0], [0], [1], [0, 0, 1, 1], [], []>} : vector<16x128xbf16>, vector<128x128xbf16>, vector<16x128xf32> -> vector<16x128xf32>
    %c0_9 = arith.constant 0 : index
    %c0_10 = arith.constant 0 : index
    %11 = vector.load %arg5[%c0_9, %c0_10] : memref<1x128xf32, #tpu.memory_space<vmem>>, vector<1x128xf32>
    %12 = vector.broadcast %11 : vector<1x128xf32> to vector<16x128xf32>
    %13 = arith.addf %10, %12 : vector<16x128xf32>
    %cst_11 = arith.constant 0.000000e+00 : f32
    %14 = vector.broadcast %cst_11 : f32 to vector<16x128xf32>
    %15 = arith.maximumf %13, %14 : vector<16x128xf32>
    %16 = arith.truncf %15 : vector<16x128xf32> to vector<16x128xbf16>
    %c0_12 = arith.constant 0 : index
    %c0_13 = arith.constant 0 : index
    %17 = vector.load %arg6[%c0_12, %c0_13] : memref<128x128xbf16, #tpu.memory_space<vmem>>, vector<128x128xbf16>
    %cst_14 = arith.constant dense<0.000000e+00> : vector<16x128xf32>
    %18 = tpu.matmul %16, %17, %cst_14 {dimension_numbers = #tpu.dot_dimension_numbers<[1], [0], [0], [1], [0, 0, 1, 1], [], []>} : vector<16x128xbf16>, vector<128x128xbf16>, vector<16x128xf32> -> vector<16x128xf32>
    %c0_15 = arith.constant 0 : index
    %c0_16 = arith.constant 0 : index
    %19 = vector.load %arg7[%c0_15, %c0_16] : memref<1x128xf32, #tpu.memory_space<vmem>>, vector<1x128xf32>
    %20 = vector.broadcast %19 : vector<1x128xf32> to vector<16x128xf32>
    %21 = arith.addf %18, %20 : vector<16x128xf32>
    %cst_17 = arith.constant 0.000000e+00 : f32
    %22 = vector.broadcast %cst_17 : f32 to vector<16x128xf32>
    %23 = arith.maximumf %21, %22 : vector<16x128xf32>
    %24 = arith.truncf %23 : vector<16x128xf32> to vector<16x128xbf16>
    %c0_18 = arith.constant 0 : index
    %c0_19 = arith.constant 0 : index
    %25 = vector.load %arg8[%c0_18, %c0_19] : memref<128x128xbf16, #tpu.memory_space<vmem>>, vector<128x128xbf16>
    %cst_20 = arith.constant dense<0.000000e+00> : vector<16x128xf32>
    %26 = tpu.matmul %24, %25, %cst_20 {dimension_numbers = #tpu.dot_dimension_numbers<[1], [0], [0], [1], [0, 0, 1, 1], [], []>} : vector<16x128xbf16>, vector<128x128xbf16>, vector<16x128xf32> -> vector<16x128xf32>
    %c0_21 = arith.constant 0 : index
    %c0_22 = arith.constant 0 : index
    %27 = vector.load %arg9[%c0_21, %c0_22] : memref<1x128xf32, #tpu.memory_space<vmem>>, vector<1x128xf32>
    %28 = vector.broadcast %27 : vector<1x128xf32> to vector<16x128xf32>
    %29 = arith.addf %26, %28 : vector<16x128xf32>
    %c0_23 = arith.constant 0 : index
    %c0_24 = arith.constant 0 : index
    %30 = vector.load %arg10[%c0_23, %c0_24] : memref<16x128xf32, #tpu.memory_space<vmem>>, vector<16x128xf32>
    tpu.vector_store %arg10[%c0_23, %c0_24], %29 {strides = array<i32>} : memref<16x128xf32, #tpu.memory_space<vmem>>, vector<16x128xf32>,
    return
  }
  func.func @transform_0(%arg0: i32) -> (i32, i32) {
    %c0_i32 = arith.constant 0 : i32
    %c0_i32_0 = arith.constant 0 : i32
    return %arg0, %c0_i32 : i32, i32
  }
  func.func @transform_1(%arg0: i32) -> (i32, i32) {
    %c0_i32 = arith.constant 0 : i32
    %c0_i32_0 = arith.constant 0 : i32
    %c0_i32_1 = arith.constant 0 : i32
    return %c0_i32, %c0_i32_0 : i32, i32
  }
  func.func @transform_2(%arg0: i32) -> (i32, i32) {
    %c0_i32 = arith.constant 0 : i32
    %c0_i32_0 = arith.constant 0 : i32
    %c0_i32_1 = arith.constant 0 : i32
    return %c0_i32, %c0_i32_0 : i32, i32
  }
  func.func @transform_3(%arg0: i32) -> (i32, i32) {
    %c0_i32 = arith.constant 0 : i32
    %c0_i32_0 = arith.constant 0 : i32
    %c0_i32_1 = arith.constant 0 : i32
    return %c0_i32, %c0_i32_0 : i32, i32
  }
  func.func @transform_4(%arg0: i32) -> (i32, i32) {
    %c0_i32 = arith.constant 0 : i32
    %c0_i32_0 = arith.constant 0 : i32
    %c0_i32_1 = arith.constant 0 : i32
    return %c0_i32, %c0_i32_0 : i32, i32
  }
  func.func @transform_5(%arg0: i32) -> (i32, i32) {
    %c0_i32 = arith.constant 0 : i32
    %c0_i32_0 = arith.constant 0 : i32
    %c0_i32_1 = arith.constant 0 : i32
    return %c0_i32, %c0_i32_0 : i32, i32
  }
  func.func @transform_6(%arg0: i32) -> (i32, i32) {
    %c0_i32 = arith.constant 0 : i32
    %c0_i32_0 = arith.constant 0 : i32
    %c0_i32_1 = arith.constant 0 : i32
    return %c0_i32, %c0_i32_0 : i32, i32
  }
  func.func @transform_7(%arg0: i32) -> (i32, i32) {
    %c0_i32 = arith.constant 0 : i32
    %c0_i32_0 = arith.constant 0 : i32
    %c0_i32_1 = arith.constant 0 : i32
    return %c0_i32, %c0_i32_0 : i32, i32
  }
  func.func @transform_8(%arg0: i32) -> (i32, i32) {
    %c0_i32 = arith.constant 0 : i32
    %c0_i32_0 = arith.constant 0 : i32
    %c0_i32_1 = arith.constant 0 : i32
    return %c0_i32, %c0_i32_0 : i32, i32
  }
  func.func @transform_9(%arg0: i32) -> (i32, i32) {
    %c0_i32 = arith.constant 0 : i32
    %c0_i32_0 = arith.constant 0 : i32
    return %arg0, %c0_i32 : i32, i32
  }
}

</mosaic_0001>

<bundles_post_ra>
// kernel: fc1_forward.1
= control target key start
LH: loop header
LB: loop body
LE: loop exit
PB: predicated region body
PF: predicated region fallthrough
CT: control target
= control target key end

     0   :  { %14 = vsyncpa [#allocation3], 0  ;;  %s1234_s0 = inlined_call_operand.hbm [shape: bf16[16,10], index: 0, kind: input, shape index: {}]   ;;  %s1235_s1 = inlined_call_operand.hbm [shape: bf16[10,128], index: 1, kind: input, shape index: {}]   ;;  %s1236_s2 = inlined_call_operand.hbm [shape: f32[1,128], index: 2, kind: input, shape index: {}]   ;;  %s1237_s3 = inlined_call_operand.hbm [shape: bf16[128,128], index: 3, kind: input, shape index: {}]   ;;  %s1238_s4 = inlined_call_operand.hbm [shape: f32[1,128], index: 4, kind: input, shape index: {}]   ;;  %s1239_s5 = inlined_call_operand.hbm [shape: bf16[128,128], index: 5, kind: input, shape index: {}]   ;;  %s1240_s6 = inlined_call_operand.hbm [shape: f32[1,128], index: 6, kind: input, shape index: {}]   ;;  %s1241_s7 = inlined_call_operand.hbm [shape: bf16[128,128], index: 7, kind: input, shape index: {}]   ;;  %s1242_s8 = inlined_call_operand.hbm [shape: f32[1,128], index: 8, kind: input, shape index: {}]   ;;  %s1243_s9 = inlined_call_operand.hbm [shape: f32[16,128], index: 9, kind: output, shape index: {}]  }
   0x1   :  { %15 = vsyncpa [#allocation6], 0 }
   0x2   :  { %16 = vsyncpa [#allocation9], 0 }
   0x3   :  { %17 = vsyncpa [#allocation12], 0 }
   0x4   :  { %18 = vsyncpa [#allocation15], 0 }
   0x5   :  { %19 = vsyncpa [#allocation4], 0  ;;  %s986_s30 = smov [#allocation5]   ;;  %s987_s11 = smov [#allocation8]  }
   0x6   :  { %s37_s10 = sshll.u32 %s986_s30, 4  ;;  %s59_s12 = sshll.u32 %s987_s11, 4  ;;  %s38_s10 = int_to_ptr.vmem [resolvable:$true] %s37_s10  ;;  %s1052_s12 = int_to_ptr.vmem [resolvable:$true] %s59_s12 }
   0x7   :  { %s754_s15 = scalar_lea.hbm %s1235_s1, 128 }
   0x8   :  { %p755_p0 = scmp.ne.s32.totalorder %s1235_s1, %s754_s15  ;;  %p758_p1 = scmp.lt.u32.totalorder %s754_s15, %s1235_s1 }
   0xa   :  { %p760_p2 = pnand %p758_p1, %p755_p0 }
   0xc   :  { %763 = shalt.err (!%p760_p2)
}
   0xd   :  { %s764_s20 = scalar_lea.vmem %s38_s10, 128  ;;  %p769_p4 = scmp.lt.s32.totalorder %s38_s10, %s38_s10 }
   0xe   :  { %p765_p3 = scmp.ne.s32.totalorder %s38_s10, %s764_s20  ;;  %p770_p5 = scmp.lt.s32.totalorder %s764_s20, %s764_s20 }
  0x10   :  { %p771_p6 = por %p770_p5, %p769_p4 }
  0x12   :  { %p772_p7 = pnand %p771_p6, %p765_p3 }
  0x14   :  { %775 = shalt.err (!%p772_p7)
}
  0x15   :  { %s988_s21 = smov 64   ;;  %s989_s22 = smov 4  }
  0x16   :  { %43 = dma.hbm_to_vmem [thread:$0]  %s1235_s1, 128, %s38_s10, [#allocation6], %s988_s21, %s988_s21, %s989_s22  }
  0x17   :  { %s776_s27 = scalar_lea.hbm %s1237_s3, 1024 }
  0x18   :  { %p777_p8 = scmp.ne.s32.totalorder %s1237_s3, %s776_s27  ;;  %p780_p9 = scmp.lt.u32.totalorder %s776_s27, %s1237_s3 }
  0x1a   :  { %p782_p10 = pnand %p780_p9, %p777_p8 }
  0x1c   :  { %785 = shalt.err (!%p782_p10)
}
  0x1d   :  { %s786_s13 = scalar_lea.vmem %s1052_s12, 1024  ;;  %p791_p12 = scmp.lt.s32.totalorder %s1052_s12, %s1052_s12 }
  0x1e   :  { %p787_p11 = scmp.ne.s32.totalorder %s1052_s12, %s786_s13  ;;  %p792_p13 = scmp.lt.s32.totalorder %s786_s13, %s786_s13 }
  0x20   :  { %p793_p0 = por %p792_p13, %p791_p12 }
  0x22   :  { %p794_p1 = pnand %p793_p0, %p787_p11 }
  0x24   :  { %797 = shalt.err (!%p794_p1)
}
  0x25   :  { %65 = dma.hbm_to_vmem [thread:$0]  %s1237_s3, 1024, %s1052_s12, [#allocation9], %s988_s21, %s988_s21, %s989_s22  }
  0x26   :  { %s990_s14 = smov [#allocation11]   ;;  %s991_s16 = smov [#allocation14]  }
  0x27   :  { %s81_s15 = sshll.u32 %s990_s14, 4  ;;  %s103_s17 = sshll.u32 %s991_s16, 4  ;;  %s82_s15 = int_to_ptr.vmem [resolvable:$true] %s81_s15  ;;  %s1089_s17 = int_to_ptr.vmem [resolvable:$true] %s103_s17 }
  0x28   :  { %s798_s20 = scalar_lea.hbm %s1239_s5, 1024 }
  0x29   :  { %p799_p2 = scmp.ne.s32.totalorder %s1239_s5, %s798_s20  ;;  %p802_p3 = scmp.lt.u32.totalorder %s798_s20, %s1239_s5 }
  0x2b   :  { %p804_p4 = pnand %p802_p3, %p799_p2 }
  0x2d   :  { %807 = shalt.err (!%p804_p4)
}
  0x2e   :  { %s808_s3 = scalar_lea.vmem %s82_s15, 1024  ;;  %p813_p6 = scmp.lt.s32.totalorder %s82_s15, %s82_s15 }
  0x2f   :  { %p809_p5 = scmp.ne.s32.totalorder %s82_s15, %s808_s3  ;;  %p814_p7 = scmp.lt.s32.totalorder %s808_s3, %s808_s3 }
  0x31   :  { %p815_p8 = por %p814_p7, %p813_p6 }
  0x33   :  { %p816_p9 = pnand %p815_p8, %p809_p5 }
  0x35   :  { %819 = shalt.err (!%p816_p9)
}
  0x36   :  { %87 = dma.hbm_to_vmem [thread:$0]  %s1239_s5, 1024, %s82_s15, [#allocation12], %s988_s21, %s988_s21, %s989_s22  }
  0x37   :  { %s820_s30 = scalar_lea.hbm %s1241_s7, 1024 }
  0x38   :  { %p821_p10 = scmp.ne.s32.totalorder %s1241_s7, %s820_s30  ;;  %p824_p11 = scmp.lt.u32.totalorder %s820_s30, %s1241_s7 }
  0x3a   :  { %p826_p12 = pnand %p824_p11, %p821_p10 }
  0x3c   :  { %829 = shalt.err (!%p826_p12)
}
  0x3d   :  { %s830_s14 = scalar_lea.vmem %s1089_s17, 1024  ;;  %p835_p0 = scmp.lt.s32.totalorder %s1089_s17, %s1089_s17 }
  0x3e   :  { %p831_p13 = scmp.ne.s32.totalorder %s1089_s17, %s830_s14  ;;  %p836_p1 = scmp.lt.s32.totalorder %s830_s14, %s830_s14 }
  0x40   :  { %p837_p2 = por %p836_p1, %p835_p0 }
  0x42   :  { %p838_p3 = pnand %p837_p2, %p831_p13 }
  0x44   :  { %841 = shalt.err (!%p838_p3)
}
  0x45   :  { %109 = dma.hbm_to_vmem [thread:$0]  %s1241_s7, 1024, %s1089_s17, [#allocation15], %s988_s21, %s988_s21, %s989_s22  }
  0x46   :  { %s992_s16 = smov [#allocation2]   ;;  %s993_s19 = smov [#allocation7]  }
  0x47   :  { %s25_s18 = sshll.u32 %s992_s16, 4  ;;  %s50_s20 = sshll.u32 %s993_s19, 4  ;;  %s26_s18 = int_to_ptr.vmem [resolvable:$true] %s25_s18  ;;  %s51_s20 = int_to_ptr.vmem [resolvable:$true] %s50_s20 }
  0x48   :  { %s842_s25 = scalar_lea.hbm %s1234_s0, 128 }
  0x49   :  { %p843_p4 = scmp.ne.s32.totalorder %s1234_s0, %s842_s25  ;;  %p846_p5 = scmp.lt.u32.totalorder %s842_s25, %s1234_s0 }
  0x4b   :  { %p848_p6 = pnand %p846_p5, %p843_p4 }
  0x4d   :  { %851 = shalt.err (!%p848_p6)
}
  0x4e   :  { %s852_s7 = scalar_lea.vmem %s26_s18, 128  ;;  %p857_p8 = scmp.lt.s32.totalorder %s26_s18, %s26_s18 }
  0x4f   :  { %p853_p7 = scmp.ne.s32.totalorder %s26_s18, %s852_s7  ;;  %p858_p9 = scmp.lt.s32.totalorder %s852_s7, %s852_s7 }
  0x51   :  { %p859_p10 = por %p858_p9, %p857_p8 }
  0x53   :  { %p860_p11 = pnand %p859_p10, %p853_p7 }
  0x55   :  { %863 = shalt.err (!%p860_p11)
}
  0x56   :  { %31 = dma.hbm_to_vmem [thread:$0]  %s1234_s0, 128, %s26_s18, [#allocation3], %s988_s21, %s988_s21, %s989_s22  }
  0x57   :  { %s864_s11 = scalar_lea.hbm %s1236_s2, 16 }
  0x58   :  { %p865_p12 = scmp.ne.s32.totalorder %s1236_s2, %s864_s11  ;;  %p868_p13 = scmp.lt.u32.totalorder %s864_s11, %s1236_s2 }
  0x5a   :  { %p870_p0 = pnand %p868_p13, %p865_p12 }
  0x5c   :  { %873 = shalt.err (!%p870_p0)
}
  0x5d   :  { %s874_s5 = scalar_lea.vmem %s51_s20, 16  ;;  %s878_s15 = scalar_lea.vmem %s51_s20, 32 }
  0x5e   :  { %p875_p1 = scmp.ne.s32.totalorder %s51_s20, %s874_s5  ;;  %p879_p2 = scmp.lt.s32.totalorder %s51_s20, %s51_s20 }
  0x5f   :  { %p880_p3 = scmp.lt.s32.totalorder %s878_s15, %s874_s5 }
  0x61   :  { %p881_p4 = por %p880_p3, %p879_p2 }
  0x63   :  { %p882_p5 = pnand %p881_p4, %p875_p1 }
  0x65   :  { %885 = shalt.err (!%p882_p5)
}
  0x66   :  { %53 = dma.hbm_to_vmem [thread:$0]  %s1236_s2, 16, %s51_s20, [#allocation6]  }
  0x67   :  { %s994_s22 = smov [#allocation10]   ;;  %s995_s18 = smov [#allocation13]  }
  0x68   :  { %s72_s16 = sshll.u32 %s994_s22, 4  ;;  %s94_s19 = sshll.u32 %s995_s18, 4  ;;  %s73_s16 = int_to_ptr.vmem [resolvable:$true] %s72_s16  ;;  %s95_s19 = int_to_ptr.vmem [resolvable:$true] %s94_s19 }
  0x69   :  { %s886_s25 = scalar_lea.hbm %s1238_s4, 16 }
  0x6a   :  { %p887_p6 = scmp.ne.s32.totalorder %s1238_s4, %s886_s25  ;;  %p890_p7 = scmp.lt.u32.totalorder %s886_s25, %s1238_s4 }
  0x6c   :  { %p892_p8 = pnand %p890_p7, %p887_p6 }
  0x6e   :  { %895 = shalt.err (!%p892_p8)
}
  0x6f   :  { %s896_s2 = scalar_lea.vmem %s73_s16, 16  ;;  %s900_s20 = scalar_lea.vmem %s73_s16, 32 }
  0x70   :  { %p897_p9 = scmp.ne.s32.totalorder %s73_s16, %s896_s2  ;;  %p901_p10 = scmp.lt.s32.totalorder %s73_s16, %s73_s16 }
  0x71   :  { %p902_p11 = scmp.lt.s32.totalorder %s900_s20, %s896_s2 }
  0x73   :  { %p903_p12 = por %p902_p11, %p901_p10 }
  0x75   :  { %p904_p13 = pnand %p903_p12, %p897_p9 }
  0x77   :  { %907 = shalt.err (!%p904_p13)
}
  0x78   :  { %75 = dma.hbm_to_vmem [thread:$0]  %s1238_s4, 16, %s73_s16, [#allocation9]  }
  0x79   :  { %s908_s30 = scalar_lea.hbm %s1240_s6, 16 }
  0x7a   :  { %p909_p0 = scmp.ne.s32.totalorder %s1240_s6, %s908_s30  ;;  %p912_p1 = scmp.lt.u32.totalorder %s908_s30, %s1240_s6 }
  0x7c   :  { %p914_p2 = pnand %p912_p1, %p909_p0 }
  0x7e   :  { %917 = shalt.err (!%p914_p2)
}
  0x7f   :  { %s918_s14 = scalar_lea.vmem %s95_s19, 16  ;;  %s922_s5 = scalar_lea.vmem %s95_s19, 32 }
  0x80   :  { %p919_p3 = scmp.ne.s32.totalorder %s95_s19, %s918_s14  ;;  %p923_p4 = scmp.lt.s32.totalorder %s95_s19, %s95_s19 }
  0x81   :  { %p924_p5 = scmp.lt.s32.totalorder %s922_s5, %s918_s14 }
  0x83   :  { %p925_p6 = por %p924_p5, %p923_p4 }
  0x85   :  { %p926_p7 = pnand %p925_p6, %p919_p3 }
  0x87   :  { %929 = shalt.err (!%p926_p7)
}
  0x88   :  { %97 = dma.hbm_to_vmem [thread:$0]  %s1240_s6, 16, %s95_s19, [#allocation12]  }
  0x89   :  { %s996_s0 = smov [#allocation16]   ;;  %s930_s18 = scalar_lea.hbm %s1242_s8, 16 }
  0x8a   :  { %s116_s21 = sshll.u32 %s996_s0, 4  ;;  %p931_p8 = scmp.ne.s32.totalorder %s1242_s8, %s930_s18  ;;  %s117_s21 = int_to_ptr.vmem [resolvable:$true] %s116_s21 }
  0x8b   :  { %p934_p9 = scmp.lt.u32.totalorder %s930_s18, %s1242_s8 }
  0x8d   :  { %p936_p10 = pnand %p934_p9, %p931_p8 }
  0x8f   :  { %939 = shalt.err (!%p936_p10)
}
  0x90   :  { %s940_s3 = scalar_lea.vmem %s117_s21, 16  ;;  %s944_s6 = scalar_lea.vmem %s117_s21, 32 }
  0x91   :  { %p941_p11 = scmp.ne.s32.totalorder %s117_s21, %s940_s3  ;;  %p945_p12 = scmp.lt.s32.totalorder %s117_s21, %s117_s21 }
  0x92   :  { %p946_p13 = scmp.lt.s32.totalorder %s944_s6, %s940_s3 }
  0x94   :  { %p947_p0 = por %p946_p13, %p945_p12 }
  0x96   :  { %p948_p1 = pnand %p947_p0, %p941_p11 }
  0x98   :  { %951 = shalt.err (!%p948_p1)
}
  0x99   :  { %119 = dma.hbm_to_vmem [thread:$0]  %s1242_s8, 16, %s117_s21, [#allocation15]  }
  0x9a   :  { %974 = dma.done.wait [#allocation3], 128  }
  0x9b   :  { %975 = vsyncadd [#allocation3], 4294967168 }
  0x9c   :  { %976 = dma.done.wait [#allocation6], 144  }
  0x9d   :  { %977 = vsyncadd [#allocation6], 4294967152 }
  0x9e   :  { %978 = dma.done.wait [#allocation9], 1040  }
  0x9f   :  { %979 = vsyncadd [#allocation9], 4294966256 }
  0xa0   :  { %980 = dma.done.wait [#allocation12], 1040  }
  0xa1   :  { %981 = vsyncadd [#allocation12], 4294966256 }
  0xa2   :  { %982 = dma.done.wait [#allocation15], 1040  }
  0xa3   :  { %983 = vsyncadd [#allocation15], 4294966256  ;;  %v997_v0 = vmov 0.0   ;;  %vm998_vm0 = vmmov 0   ;;  %vm173_vm1 = vcmask 1044480   ;;  %v729_v2 = vld [vmem:[#allocation2] sm:$0xff]  }
  0xa4   :  { %646 = vmatprep.subr.bf16.mxu0 %v997_v0  ;;  %648 = vmatprep.mubr.msk.bf16.mxu0 %vm998_vm0, %v997_v0  ;;  %v728_v1 = vld [vmem:[#allocation5] sm:$0x1f]   ;;  %v730_v4 = vld [vmem:[#allocation8] sm:$0xff]   ;;  %vm169_vm2 = vcmask 80896   ;;  %v731_v5 = vld [vmem:[#allocation8 + $0x8] sm:$0xff]   ;;  %s999_s8 = smov [#allocation17]  }
  0xa5   :  { %652 = vmatprep.subr.bf16.mxu1 %v997_v0  ;;  %668 = vmatprep.mubr.msk.bf16.mxu1 %vm998_vm0, %v997_v0  ;;  %v175_v3 = vsel %vm173_vm1, %v728_v1, 0  ;;  %v732_v6 = vld [vmem:[#allocation8 + $0x10] sm:$0xff]   ;;  %v733_v7 = vld [vmem:[#allocation8 + $0x18] sm:$0xff]   ;;  %v734_v8 = vld [vmem:[#allocation8 + $0x20] sm:$0xff]   ;;  %s570_s27 = sshll.u32 %s999_s8, 4  ;;  %s571_s27 = int_to_ptr.vmem [resolvable:$true] %s570_s27 }
  0xa6   :  { %647 = vmatpush3.bf16.msra.mxu0 %v175_v3  ;;  %653 = vmatpush3.bf16.msra.mxu1 %v730_v4  ;;  %v735_v9 = vld [vmem:[#allocation8 + $0x28] sm:$0xff]   ;;  %v736_v10 = vld [vmem:[#allocation8 + $0x30] sm:$0xff]   ;;  %v737_v11 = vld [vmem:[#allocation8 + $0x38] sm:$0xff]   ;;  %s952_s2 = scalar_lea.vmem %s571_s27, 256  ;;  %p957_p3 = scmp.lt.s32.totalorder %s571_s27, %s571_s27 }
  0xa7   :  { %672 = vmatprep.subr.bf16.mxu0 %v997_v0  ;;  %654 = vmatprep.subr.bf16.mxu1 %v997_v0  ;;  %v738_v12 = vld [vmem:[#allocation11] sm:$0xff]   ;;  %v739_v13 = vld [vmem:[#allocation11 + $0x8] sm:$0xff]   ;;  %v740_v14 = vld [vmem:[#allocation11 + $0x10] sm:$0xff]   ;;  %p953_p2 = scmp.ne.s32.totalorder %s571_s27, %s952_s2  ;;  %p958_p4 = scmp.lt.s32.totalorder %s952_s2, %s952_s2 }
  0xa8   :  { %v741_v15 = vld [vmem:[#allocation11 + $0x18] sm:$0xff]   ;;  %v742_v16 = vld [vmem:[#allocation11 + $0x20] sm:$0xff]   ;;  %v743_v17 = vld [vmem:[#allocation11 + $0x28] sm:$0xff]  }
  0xa9   :  { %649 = vmatmul.mubr.msk.bf16.vlgmr.msra.gmra.mrb[0].mxu0 %vm169_vm2, %v729_v2  ;;  %v586_v18 = vld [vmem:[#allocation7] ss:$0 sm:$0xff]  ;;  %v744_v28 = vld [vmem:[#allocation11 + $0x30] sm:$0xff]   ;;  %v746_v30 = vld [vmem:[#allocation14] sm:$0xff]   ;;  %p959_p5 = por %p958_p4, %p957_p3 }
  0xaa   :  { %688 = vmatprep.mubr.msk.bf16.mxu0 %vm998_vm0, %v997_v0  ;;  %655 = vmatpush3.bf16.msra.mxu1 %v731_v5  ;;  %v745_v29 = vld [vmem:[#allocation11 + $0x38] sm:$0xff]   ;;  %v747_v31 = vld [vmem:[#allocation14 + $0x8] sm:$0xff]   ;;  %v750_v34 = vld [vmem:[#allocation14 + $0x20] sm:$0xff]  }
  0xab   :  { %656 = vmatprep.subr.bf16.mxu1 %v997_v0  ;;  %673 = vmatpush3.bf16.msra.mxu0 %v738_v12  ;;  %v748_v32 = vld [vmem:[#allocation14 + $0x10] sm:$0xff]   ;;  %v749_v33 = vld [vmem:[#allocation14 + $0x18] sm:$0xff]   ;;  %v751_v35 = vld [vmem:[#allocation14 + $0x28] sm:$0xff]   ;;  %p960_p6 = pnand %p959_p5, %p953_p2 }
  0xac   :  { %674 = vmatprep.subr.bf16.mxu0 %v997_v0  ;;  %v590_v36 = vld [vmem:[#allocation10] ss:$0 sm:$0xff]  ;;  %v752_v46 = vld [vmem:[#allocation14 + $0x30] sm:$0xff]   ;;  %v599_v48 = vld [vmem:[#allocation13] ss:$0 sm:$0xff] }
  0xad   :  { %v753_v47 = vld [vmem:[#allocation14 + $0x38] sm:$0xff]   ;;  %v608_v58 = vld [vmem:[#allocation16] ss:$0 sm:$0xff] }
  0xae   :  { %657 = vmatpush3.bf16.msra.mxu1 %v732_v6 }
  0xaf   :  { %658 = vmatprep.subr.bf16.mxu1 %v997_v0  ;;  %675 = vmatpush3.bf16.msra.mxu0 %v739_v13 }
  0xb0   :  { %676 = vmatprep.subr.bf16.mxu0 %v997_v0 }
  0xb2   :  { %659 = vmatpush3.bf16.msra.mxu1 %v733_v7 }
  0xb3   :  { %660 = vmatprep.subr.bf16.mxu1 %v997_v0  ;;  %677 = vmatpush3.bf16.msra.mxu0 %v740_v14 }
  0xb4   :  { %678 = vmatprep.subr.bf16.mxu0 %v997_v0 }
  0xb6   :  { %661 = vmatpush3.bf16.msra.mxu1 %v734_v8 }
  0xb7   :  { %662 = vmatprep.subr.bf16.mxu1 %v997_v0  ;;  %679 = vmatpush3.bf16.msra.mxu0 %v741_v15 }
  0xb8   :  { %680 = vmatprep.subr.bf16.mxu0 %v997_v0 }
  0xba   :  { %663 = vmatpush3.bf16.msra.mxu1 %v735_v9 }
  0xbb   :  { %664 = vmatprep.subr.bf16.mxu1 %v997_v0  ;;  %681 = vmatpush3.bf16.msra.mxu0 %v742_v16 }
  0xbc   :  { %682 = vmatprep.subr.bf16.mxu0 %v997_v0 }
  0xbe   :  { %665 = vmatpush3.bf16.msra.mxu1 %v736_v10 }
  0xbf   :  { %666 = vmatprep.subr.bf16.mxu1 %v997_v0  ;;  %683 = vmatpush3.bf16.msra.mxu0 %v743_v17 }
  0xc0   :  { %684 = vmatprep.subr.bf16.mxu0 %v997_v0 }
  0xc2   :  { %667 = vmatpush3.bf16.msra.mxu1 %v737_v11 }
  0xc3   :  { %692 = vmatprep.subr.bf16.mxu1 %v997_v0  ;;  %685 = vmatpush3.bf16.msra.mxu0 %v744_v28 }
  0xc4   :  { %686 = vmatprep.subr.bf16.mxu0 %v997_v0 }
  0xc7   :  { %687 = vmatpush3.bf16.msra.mxu0 %v745_v29 }
 0x17c   :  { %v211_v19 = vpop.f32.mrb[0].mxu0 }
 0x17d   :  { %v212_v20 = vadd.f32 %v586_v18, %v211_v19  ;;  %v650_v21 = vpop.f32.mrb[1].mxu0 }
 0x17e   :  { %v214_v22 = vpop.f32.mrb[2].mxu0 }
 0x17f   :  { %v215_v23 = vadd.f32 %v586_v18, %v214_v22  ;;  %v651_v24 = vpop.f32.mrb[3].mxu0  ;;  %v218_v25 = vmax.f32 %v212_v20, 0.0 }
 0x181   :  { %v219_v26 = vmax.f32 %v215_v23, 0.0 }
 0x183   :  { %v220_v27 = vpack.c.bf16 %v219_v26, %v218_v25 }
 0x185   :  { %669 = vmatmul.mubr.bf16.vlgmr.msra.gmra.mrb[0].mxu1 %v220_v27 }
 0x186   :  { %708 = vmatprep.mubr.msk.bf16.mxu1 %vm998_vm0, %v997_v0  ;;  %693 = vmatpush3.bf16.msra.mxu1 %v746_v30 }
 0x187   :  { %694 = vmatprep.subr.bf16.mxu1 %v997_v0 }
 0x18a   :  { %695 = vmatpush3.bf16.msra.mxu1 %v747_v31 }
 0x18b   :  { %696 = vmatprep.subr.bf16.mxu1 %v997_v0 }
 0x18e   :  { %697 = vmatpush3.bf16.msra.mxu1 %v748_v32 }
 0x18f   :  { %698 = vmatprep.subr.bf16.mxu1 %v997_v0 }
 0x192   :  { %699 = vmatpush3.bf16.msra.mxu1 %v749_v33 }
 0x193   :  { %700 = vmatprep.subr.bf16.mxu1 %v997_v0 }
 0x196   :  { %701 = vmatpush3.bf16.msra.mxu1 %v750_v34 }
 0x197   :  { %702 = vmatprep.subr.bf16.mxu1 %v997_v0 }
 0x19a   :  { %703 = vmatpush3.bf16.msra.mxu1 %v751_v35 }
 0x19b   :  { %704 = vmatprep.subr.bf16.mxu1 %v997_v0 }
 0x19e   :  { %705 = vmatpush3.bf16.msra.mxu1 %v752_v46 }
 0x19f   :  { %706 = vmatprep.subr.bf16.mxu1 %v997_v0 }
 0x1a2   :  { %707 = vmatpush3.bf16.msra.mxu1 %v753_v47 }
 0x258   :  { %v326_v37 = vpop.f32.mrb[0].mxu1 }
 0x259   :  { %v327_v38 = vadd.f32 %v590_v36, %v326_v37  ;;  %v670_v39 = vpop.f32.mrb[1].mxu1 }
 0x25a   :  { %v329_v40 = vpop.f32.mrb[2].mxu1 }
 0x25b   :  { %v330_v41 = vadd.f32 %v590_v36, %v329_v40  ;;  %v671_v42 = vpop.f32.mrb[3].mxu1  ;;  %v333_v43 = vmax.f32 %v327_v38, 0.0 }
 0x25d   :  { %v334_v44 = vmax.f32 %v330_v41, 0.0 }
 0x25f   :  { %v335_v45 = vpack.c.bf16 %v334_v44, %v333_v43 }
 0x261   :  { %689 = vmatmul.mubr.bf16.vlgmr.msra.gmra.mrb[4].mxu0 %v335_v45 }
 0x334   :  { %v441_v49 = vpop.f32.mrb[4].mxu0 }
 0x335   :  { %v442_v50 = vadd.f32 %v599_v48, %v441_v49  ;;  %v690_v51 = vpop.f32.mrb[5].mxu0 }
 0x336   :  { %v444_v52 = vpop.f32.mrb[6].mxu0 }
 0x337   :  { %v445_v53 = vadd.f32 %v599_v48, %v444_v52  ;;  %v691_v54 = vpop.f32.mrb[7].mxu0  ;;  %v448_v55 = vmax.f32 %v442_v50, 0.0 }
 0x339   :  { %v449_v56 = vmax.f32 %v445_v53, 0.0 }
 0x33b   :  { %v450_v57 = vpack.c.bf16 %v449_v56, %v448_v55 }
 0x33d   :  { %709 = vmatmul.mubr.bf16.vlgmr.msra.gmra.mrb[4].mxu1 %v450_v57 }
 0x410   :  { %v556_v59 = vpop.f32.mrb[4].mxu1 }
 0x411   :  { %v557_v60 = vadd.f32 %v608_v58, %v556_v59  ;;  %v710_v61 = vpop.f32.mrb[5].mxu1 }
 0x412   :  { %v559_v62 = vpop.f32.mrb[6].mxu1 }
 0x413   :  { %563 = vst [vmem:[#allocation17] sm:$0xff] %v557_v60  ;;  %v560_v63 = vadd.f32 %v608_v58, %v559_v62  ;;  %v711_v0 = vpop.f32.mrb[7].mxu1 }
 0x415   :  { %564 = vst [vmem:[#allocation17 + $0x8] sm:$0xff] %v560_v63 }
 0x416   :  { %963 = shalt.err (!%p960_p6)
}
 0x417   :  { %s964_s17 = scalar_lea.hbm %s1243_s9, 256 }
 0x418   :  { %p965_p7 = scmp.ne.s32.totalorder %s1243_s9, %s964_s17  ;;  %p968_p8 = scmp.lt.u32.totalorder %s964_s17, %s1243_s9 }
 0x41a   :  { %p970_p9 = pnand %p968_p8, %p965_p7 }
 0x41c   :  { %973 = shalt.err (!%p970_p9)
}
 0x41d   :  { %s1000_s13 = smov 128   ;;  %s1001_s1 = smov 8  }
 0x41e   :  { %576 = dma.vmem_to_hbm [thread:$0]  %s571_s27, 256, %s1243_s9, [#allocation4], %s1000_s13, %s1000_s13, %s1001_s1  }
 0x41f   :  { %984 = dma.done.wait [#allocation4], 256  }
 0x420   :  { %985 = vsyncadd [#allocation4], 4294967040 }
 0x421   :  { %580 = vsyncpa [#allocation3], 1 }
 0x422   :  { %581 = vsyncpa [#allocation6], 1 }
 0x423   :  { %582 = vsyncpa [#allocation9], 1 }
 0x424   :  { %583 = vsyncpa [#allocation12], 1 }
 0x425   :  { %584 = vsyncpa [#allocation15], 1 }
 0x426   :  { %585 = vsyncpa [#allocation4], 1 }

</bundles_post_ra>
